<compile_context>
chip_gen: v6e
topology: v6e:2x2x1
jax: 0.10.0
libtpu: 0.0.40
codegen_flags: <defaults>
</compile_context>

<pallas_src>
import jax
import jax.numpy as jnp
from jax.experimental import pallas as pl
from jax.experimental.pallas import tpu as pltpu


def _round_up(x, m):
    return ((x + m - 1) // m) * m


def edge_expansion_kernel(x_ref, w_ref, o_ref):
    # x_ref: (TN, D)    VMEM, input dtype
    # w_ref: (1, C*D)   VMEM, fp32  -- w_ref[0, c*D + d] == W[c, 0]
    # o_ref: (TN, C*D)  VMEM, output dtype
    D = x_ref.shape[1]
    CD = w_ref.shape[1]
    C = CD // D

    x = x_ref[...].astype(jnp.float32)                         # (TN, D)

    # ||x||^2 built from the D (tiny, static) components explicitly — no
    # cross-lane reduce needed.
    nrm2 = x[:, 0:1] * x[:, 0:1]
    for d in range(1, D):
        nrm2 = nrm2 + x[:, d:d + 1] * x[:, d:d + 1]

    # Exact divide for parity with torch's `x / (norm + eps)`; HBM-bound kernel,
    # so this is not on the critical path.
    inv = 1.0 / (jnp.sqrt(nrm2) + 1e-7)                         # (TN, 1)
    xn = x * inv                                                # (TN, D)

    # Replicate across channels once (lane concatenate), scale by the fp32
    # pre-expanded weight table, and do a SINGLE dense full-block store.
    xrep = jnp.concatenate([xn] * C, axis=1)                    # (TN, C*D)
    o_ref[...] = (xrep * w_ref[...]).astype(o_ref.dtype)


def edge_expansion(edge_vector, weight, *, tile_n=8192, out_dtype=None):
    """edge_vector: (N, D) float; weight: (C, 1) = nn.Linear(1, C, bias=False).weight."""
    N, D = edge_vector.shape
    C = weight.shape[0]
    CD = C * D
    if out_dtype is None:
        # Use jnp.bfloat16 here if the downstream consumer tolerates it: the
        # (N, C, D) write dominates HBM traffic.
        out_dtype = edge_vector.dtype

    # Pre-expanded fp32 weight table: w_tab[0, c*D + d] = W[c, 0].
    w_tab = jnp.repeat(weight.reshape(C).astype(jnp.float32), D).reshape(1, CD)

    # --- tile sizing --------------------------------------------------------
    # Per-row padded VMEM: both the (TN, D) input and the (TN, C*D) output
    # blocks are lane-padded to 128, and double-buffered.  Budget 24 MiB of
    # block VMEM so we stay under the 32 MiB scoped limit on every generation
    # (v7x has only 64 MiB physical VMEM).
    lanes_in = _round_up(D, 128)
    lanes_out = _round_up(CD, 128)
    bytes_per_row = 2 * 4 * (lanes_in + lanes_out)              # double-buffered fp32
    vmem_budget = 24 * 1024 * 1024
    max_tile = max(8, (vmem_budget // bytes_per_row) // 8 * 8)

    n_pad8 = _round_up(N, 8)
    tile_n = min(int(tile_n), max_tile, n_pad8)
    if n_pad8 >= 16:
        # Keep >= 2 grid steps when N allows, so the "parallel" grid axis can
        # feed both TensorCores on v7x.
        tile_n = min(tile_n, _round_up((N + 1) // 2, 8))
    tile_n = _round_up(max(tile_n, 8), 8)

    grid = (pl.cdiv(N, tile_n),)
    out_bytes = jnp.dtype(out_dtype).itemsize

    out_flat = pl.pallas_call(
        edge_expansion_kernel,
        out_shape=jax.ShapeDtypeStruct((N, CD), out_dtype),
        grid_spec=pltpu.PrefetchScalarGridSpec(
            num_scalar_prefetch=0,
            grid=grid,
            in_specs=[
                pl.BlockSpec((tile_n, D), lambda i: (i, 0)),
                # Weight table: whole (1, C*D) array, constant block index ->
                # resident in VMEM across the entire grid (fetched once).
                pl.BlockSpec((1, CD), lambda i: (0, 0)),
            ],
            out_specs=pl.BlockSpec((tile_n, CD), lambda i: (i, 0)),
        ),
        compiler_params=pltpu.CompilerParams(
            dimension_semantics=("parallel",),
            vmem_limit_bytes=32 * 1024 * 1024,
        ),
        cost_estimate=pl.CostEstimate(
            flops=N * (3 * D + 2 + 2 * CD),
            transcendentals=2 * N,
            bytes_accessed=edge_vector.dtype.itemsize * N * D
            + 4 * CD
            + out_bytes * N * CD,
        ),
    )(edge_vector, w_tab)

    # Free row-major reshape back to the PyTorch output layout (N, C, D).
    return out_flat.reshape(N, C, D)


def edge_expansion_ref(edge_vector, weight):
    v = edge_vector / (jnp.linalg.norm(edge_vector, axis=1, keepdims=True) + 1e-7)
    exp = v[..., None] * weight[:, 0][None, None, :]   # (N, D, C)
    return jnp.transpose(exp, (0, 2, 1))               # (N, C, D)


if __name__ == "__main__":
    # Small shapes consistent with the module: N edges, 3-D vectors, C channels.
    N, D, C = 200, 3, 8

    key = jax.random.PRNGKey(0)
    k_x, k_w = jax.random.split(key)

    edge_vector = jax.random.normal(k_x, (N, D), dtype=jnp.float32)
    # nn.Linear(1, C, bias=False).weight has shape (C, 1); fan_in=1 -> U(-1, 1).
    weight = jax.random.uniform(k_w, (C, 1), dtype=jnp.float32,
                                minval=-1.0, maxval=1.0)

    ref = edge_expansion_ref(edge_vector, weight)

    # tile_n=64 exercises the multi-step grid and the ragged (N % tile_n != 0) tail.
    out_small = jax.block_until_ready(edge_expansion(edge_vector, weight, tile_n=64))
    # Default path exercises the tile clamping / >=2-step (megacore) logic.
    out_default = jax.block_until_ready(edge_expansion(edge_vector, weight))

    for out in (out_small, out_default):
        assert out.shape == (N, C, D)
        # Exact divide in-kernel -> tight tolerance vs reference.
        assert jnp.allclose(out, ref, atol=1e-5, rtol=1e-5), "mismatch vs reference"

    print("KERNEL_OK")
</pallas_src>

<mosaic_0001>
module attributes {stable_mosaic.version = 11 : i64} {
  func.func @edge_expansion_kernel(%arg0: i32, %arg1: memref<64x3xf32, #tpu.memory_space<vmem>>, %arg2: memref<1x24xf32, #tpu.memory_space<vmem>>, %arg3: memref<64x24xf32, #tpu.memory_space<vmem>>) attributes {dimension_semantics = [#tpu.dimension_semantics<parallel>], iteration_bounds = array<i64: 4>, scalar_prefetch = 0 : i64, scratch_operands = 0 : i64, tpu.core_type = #tpu.core_type<tc>, window_params = [{transform_indices = @transform_0, window_bounds = array<i64: 64, 3>}, {pipeline_mode = #tpu.pipeline_mode<synchronous>, transform_indices = @transform_1, window_bounds = array<i64: 1, 24>}, {transform_indices = @transform_2, window_bounds = array<i64: 64, 24>}]} {
    %c0 = arith.constant 0 : index
    %c0_0 = arith.constant 0 : index
    %0 = vector.load %arg1[%c0, %c0_0] : memref<64x3xf32, #tpu.memory_space<vmem>>, vector<64x3xf32>
    %1 = vector.extract_strided_slice %0 {offsets = [0, 0], sizes = [64, 1], strides = [1, 1]} : vector<64x3xf32> to vector<64x1xf32>
    %2 = vector.extract_strided_slice %0 {offsets = [0, 0], sizes = [64, 1], strides = [1, 1]} : vector<64x3xf32> to vector<64x1xf32>
    %3 = arith.mulf %1, %2 : vector<64x1xf32>
    %4 = vector.extract_strided_slice %0 {offsets = [0, 1], sizes = [64, 1], strides = [1, 1]} : vector<64x3xf32> to vector<64x1xf32>
    %5 = vector.extract_strided_slice %0 {offsets = [0, 1], sizes = [64, 1], strides = [1, 1]} : vector<64x3xf32> to vector<64x1xf32>
    %6 = arith.mulf %4, %5 : vector<64x1xf32>
    %7 = arith.addf %3, %6 : vector<64x1xf32>
    %8 = vector.extract_strided_slice %0 {offsets = [0, 2], sizes = [64, 1], strides = [1, 1]} : vector<64x3xf32> to vector<64x1xf32>
    %9 = vector.extract_strided_slice %0 {offsets = [0, 2], sizes = [64, 1], strides = [1, 1]} : vector<64x3xf32> to vector<64x1xf32>
    %10 = arith.mulf %8, %9 : vector<64x1xf32>
    %11 = arith.addf %7, %10 : vector<64x1xf32>
    %12 = math.sqrt %11 : vector<64x1xf32>
    %cst = arith.constant 1.000000e-07 : f32
    %13 = vector.broadcast %cst : f32 to vector<64x1xf32>
    %14 = arith.addf %12, %13 : vector<64x1xf32>
    %cst_1 = arith.constant 1.000000e+00 : f32
    %15 = vector.broadcast %cst_1 : f32 to vector<64x1xf32>
    %16 = arith.divf %15, %14 : vector<64x1xf32>
    %17 = vector.broadcast %16 : vector<64x1xf32> to vector<64x3xf32>
    %18 = arith.mulf %0, %17 : vector<64x3xf32>
    %19 = tpu.concatenate %18, %18, %18, %18, %18, %18, %18, %18 in 1 : vector<64x3xf32>, vector<64x3xf32>, vector<64x3xf32>, vector<64x3xf32>, vector<64x3xf32>, vector<64x3xf32>, vector<64x3xf32>, vector<64x3xf32> -> vector<64x24xf32>
    %c0_2 = arith.constant 0 : index
    %c0_3 = arith.constant 0 : index
    %20 = vector.load %arg2[%c0_2, %c0_3] : memref<1x24xf32, #tpu.memory_space<vmem>>, vector<1x24xf32>
    %21 = vector.broadcast %20 : vector<1x24xf32> to vector<64x24xf32>
    %22 = arith.mulf %19, %21 : vector<64x24xf32>
    %c0_4 = arith.constant 0 : index
    %c0_5 = arith.constant 0 : index
    %23 = vector.load %arg3[%c0_4, %c0_5] : memref<64x24xf32, #tpu.memory_space<vmem>>, vector<64x24xf32>
    tpu.vector_store %arg3[%c0_4, %c0_5], %22 {strides = array<i32>} : memref<64x24xf32, #tpu.memory_space<vmem>>, vector<64x24xf32>,
    return
  }
  func.func @transform_0(%arg0: i32) -> (i32, i32) {
    %c0_i32 = arith.constant 0 : i32
    %c0_i32_0 = arith.constant 0 : i32
    return %arg0, %c0_i32 : i32, i32
  }
  func.func @transform_1(%arg0: i32) -> (i32, i32) {
    %c0_i32 = arith.constant 0 : i32
    %c0_i32_0 = arith.constant 0 : i32
    %c0_i32_1 = arith.constant 0 : i32
    return %c0_i32, %c0_i32_0 : i32, i32
  }
  func.func @transform_2(%arg0: i32) -> (i32, i32) {
    %c0_i32 = arith.constant 0 : i32
    %c0_i32_0 = arith.constant 0 : i32
    return %arg0, %c0_i32 : i32, i32
  }
}

</mosaic_0001>

<bundles_post_ra>
// kernel: tpu_custom_call.1
= control target key start
LH: loop header
LB: loop body
LE: loop exit
PB: predicated region body
PF: predicated region fallthrough
CT: control target
= control target key end

     0   :  { %s1161_s9 = smov 0   ;;  %s1163_s10 = smov 0   ;;  %s1523_s0 = inlined_call_operand.vmem [shape: f32[200,3], index: 0, kind: input, shape index: {}]   ;;  %s1524_s1 = inlined_call_operand.vmem [shape: f32[1,24], index: 1, kind: input, shape index: {}]   ;;  %s1525_s2 = inlined_call_operand.vmem [shape: f32[200,24], index: 2, kind: output, shape index: {}]  }
   0x1   :  { %s1165_s11 = smov 0  }
   0x2 LB: > { %s1174_s12 = sadd.s32 4294967295, %s1102_s11   ;;  %s1176_s13 = sadd.s32 1, %s1102_s11   ;;  %s1102_s11 = sphi %s1165_s11, %s1532_s11   ;;  %s1098_s10 = sphi %s1163_s10, %s1531_s10   ;;  %s1094_s9 = sphi %s1161_s9, %s1530_s9  }
   0x3   : > { %s63_s14 = ssub.s32 %s1102_s11, %s1176_s13  ;;  %s66_s15 = sadd.s32 1, %s1098_s10 }
   0x4   : > { %p64_p0 = scmp.eq.s32.totalorder %s63_s14, 0  ;;  %p76_p1 = scmp.ne.s32.totalorder %s1098_s10, %s1094_s9 }
   0x5   : > { %p77_p2 = scmp.eq.s32.totalorder %s1174_s12, 3  ;;  %p891_p3 = scmp.ge.s32.totalorder %s1102_s11, 1 }
   0x6   : > { %s1184_s16 = scalar_select %p64_p0, %s1098_s10, %s66_s15  }
   0x7   : > { %p1186_p4 = por %p77_p2, %p76_p1  ;;  %p121_p5 = scmp.lt.s32.totalorder %s1102_s11, 5 }
   0x9   : > { %p122_p6 = pnand %p891_p3, %p121_p5 }
   0xa   : > { %s1191_s18 = sshll.u32 (!%p122_p6), %s1174_s12, 3  ;;  %s1136_s24 = smov (!%p122_p6), 127  }
   0xb   : > { %125 = sbr.rel (%p122_p6) target bundleno = 583 (0x247), region = 28  ;;  %p151_p7 = scmp.lt.s32.totalorder (!%p122_p6), %s1191_s18, 24 }
   0xc   : > { %s1137_s25 = smov (!%p122_p6), 126   ;;  %s1139_s26 = smov (!%p122_p6), 3  }
   0xd   : > { %s1140_s27 = smov (!%p122_p6), 6   ;;  %s1141_s28 = smov (!%p122_p6), 9  }
   0xe   : > { %s1142_s29 = smov (!%p122_p6), 12   ;;  %s1143_s30 = smov (!%p122_p6), 15  }
   0xf   : > { %s1144_s3 = smov (!%p122_p6), 18   ;;  %s1145_s4 = smov (!%p122_p6), 21  }
  0x10   : > { %s152_s19 = scalar_select %p151_p7, %s1191_s18, 24  ;;  %v1138_v16 = vmov 0  }
  0x11   : > { %1015 = vset.pattern.permute.xlu1 %v1138_v16  ;;  %1014 = vset.pattern.permute.xlu0 %v1138_v16  ;;  %s143_s5 = sand.u32 1, %s1094_s9   ;;  %s652_s11 = ssub.s32 (%p1186_p4), 25, %s1191_s18 }
  0x12   : > { %s894_s20 = sshll.u32 %s152_s19, 3  ;;  %s892_s6 = sshll.u32 %s143_s5, 6 }
  0x13   : > { %s154_s23 = scalar_lea.vmem %s1523_s0, %s894_s20  ;;  %s1410_s9 = scalar_lea.vmem [#allocation2], %s892_s6  }
  0x14   : > { %v1198_v0 = vld [vmem:[%s154_s23 + $0x10] sm:$0xff]  ;;  %v1200_v1 = vld [vmem:[%s154_s23] sm:$0xff]  ;;  %v1202_v2 = vld [vmem:[%s154_s23 + $0x18] sm:$0xff]  ;;  %s913_s14 = sshll.u32 (%p1186_p4), %s1174_s12, 6  ;;  %p653_p8 = scmp.lt.s32.totalorder (%p1186_p4), %s652_s11, 8 }
  0x15   : > { %v175_v3 = vmul.f32 %v1198_v0, %v1198_v0  ;;  %v173_v4 = vmul.f32 %v1200_v1, %v1200_v1  ;;  %v1208_v5 = vld [vmem:[%s154_s23 + $0x8] sm:$0xff]  ;;  %v176_v6 = vmul.f32 %v1202_v2, %v1202_v2  ;;  %v1216_v9 = vld [vmem:[%s154_s23 + $0x20] sm:$0xff]  ;;  %v1222_v12 = vld [vmem:[%s154_s23 + $0x38] sm:$0xff]  ;;  %s1469_s20 = scalar_lea.vmem (%p1186_p4), %s1525_s2, %s913_s14  }
  0x16   : > { %v174_v7 = vmul.f32 %v1208_v5, %v1208_v5  ;;  %v1214_v8 = vld [vmem:[%s154_s23 + $0x28] sm:$0xff]  ;;  %v177_v11 = vmul.f32 %v1216_v9, %v1216_v9  ;;  %v1224_v13 = vld [vmem:[%s154_s23 + $0x30] sm:$0xff]  ;;  %v180_v14 = vmul.f32 %v1222_v12, %v1222_v12 }
  0x17   : > { %193 = vrot.lane.b32.xlu1 %v175_v3, %s1136_s24  ;;  %189 = vrot.lane.b32.xlu0 %v173_v4, %s1136_s24  ;;  %v178_v10 = vmul.f32 %v1214_v8, %v1214_v8  ;;  %v179_v15 = vmul.f32 %v1224_v13, %v1224_v13 }
  0x1b   : > { %195 = vrot.lane.b32.xlu1 %v176_v6, %s1136_s24  ;;  %191 = vrot.lane.b32.xlu0 %v174_v7, %s1136_s24 }
  0x1f   : > { %199 = vrot.lane.b32.xlu1 %v178_v10, %s1136_s24  ;;  %197 = vrot.lane.b32.xlu0 %v177_v11, %s1136_s24 }
  0x23   : > { %203 = vrot.lane.b32.xlu1 %v180_v14, %s1136_s24  ;;  %201 = vrot.lane.b32.xlu0 %v179_v15, %s1136_s24 }
  0x27   : > { %223 = vrot.lane.b32.xlu1 %v174_v7, %s1137_s25  ;;  %221 = vrot.lane.b32.xlu0 %v173_v4, %s1137_s25 }
  0x2b   : > { %227 = vrot.lane.b32.xlu1 %v176_v6, %s1137_s25  ;;  %225 = vrot.lane.b32.xlu0 %v175_v3, %s1137_s25 }
  0x2f   : > { %231 = vrot.lane.b32.xlu1 %v178_v10, %s1137_s25  ;;  %229 = vrot.lane.b32.xlu0 %v177_v11, %s1137_s25 }
  0x33   : > { %235 = vrot.lane.b32.xlu1 %v180_v14, %s1137_s25  ;;  %233 = vrot.lane.b32.xlu0 %v179_v15, %s1137_s25 }
  0x89   : > { %v194_v17 = vpop.permute.xlu1 %193  ;;  %v190_v18 = vpop.permute.xlu0 %189 }
  0x8a   : > { %v213_v25 = vadd.f32 %v190_v18, %v173_v4  ;;  %v215_v31 = vadd.f32 %v194_v17, %v175_v3 }
  0x8d   : > { %v196_v19 = vpop.permute.xlu1 %195  ;;  %v192_v20 = vpop.permute.xlu0 %191 }
  0x8e   : > { %v214_v26 = vadd.f32 %v192_v20, %v174_v7  ;;  %v216_v32 = vadd.f32 %v196_v19, %v176_v6 }
  0x91   : > { %v200_v21 = vpop.permute.xlu1 %199  ;;  %v198_v22 = vpop.permute.xlu0 %197 }
  0x92   : > { %v218_v37 = vadd.f32 %v200_v21, %v178_v10  ;;  %v217_v38 = vadd.f32 %v198_v22, %v177_v11 }
  0x95   : > { %v204_v23 = vpop.permute.xlu1 %203  ;;  %v202_v24 = vpop.permute.xlu0 %201 }
  0x96   : > { %v220_v43 = vadd.f32 %v204_v23, %v180_v14  ;;  %v219_v44 = vadd.f32 %v202_v24, %v179_v15 }
  0x99   : > { %v224_v27 = vpop.permute.xlu1 %223  ;;  %v222_v28 = vpop.permute.xlu0 %221 }
  0x9a   : > { %v246_v29 = vadd.f32 %v224_v27, %v214_v26  ;;  %v245_v30 = vadd.f32 %v222_v28, %v213_v25 }
  0x9c   : > { %1016 = vrsqrt.f32 %v246_v29  ;;  %vm262_vm0 = vcmp.eq.f32.partialorder %v246_v29, inf  ;;  %v265_v52 = vand.u32 2147483648, %v246_v29  ;;  %vm264_vm1 = vcmp.eq.f32.partialorder %v246_v29, 0.0 }
  0x9d   : > { %1018 = vrsqrt.f32 %v245_v30  ;;  %v228_v33 = vpop.permute.xlu1 %227  ;;  %v226_v34 = vpop.permute.xlu0 %225  ;;  %vm255_vm2 = vcmp.eq.f32.partialorder %v245_v30, inf  ;;  %v258_v55 = vand.u32 2147483648, %v245_v30  ;;  %vm257_vm3 = vcmp.eq.f32.partialorder %v245_v30, 0.0 }
  0x9e   : > { %v248_v35 = vadd.f32 %v228_v33, %v216_v32  ;;  %v247_v36 = vadd.f32 %v226_v34, %v215_v31 }
  0xa0   : > { %1020 = vrsqrt.f32 %v248_v35  ;;  %vm276_vm4 = vcmp.eq.f32.partialorder %v248_v35, inf  ;;  %vm278_vm5 = vcmp.eq.f32.partialorder %v248_v35, 0.0  ;;  %v279_v3 = vand.u32 2147483648, %v248_v35 }
  0xa1   : > { %1022 = vrsqrt.f32 %v247_v36  ;;  %v232_v39 = vpop.permute.xlu1 %231  ;;  %v230_v40 = vpop.permute.xlu0 %229  ;;  %vm269_vm6 = vcmp.eq.f32.partialorder %v247_v36, inf  ;;  %v272_v7 = vand.u32 2147483648, %v247_v36  ;;  %vm271_vm7 = vcmp.eq.f32.partialorder %v247_v36, 0.0 }
  0xa2   : > { %v250_v41 = vadd.f32 %v232_v39, %v218_v37  ;;  %v1230_v42 = vadd.f32 %v230_v40, %v217_v38 }
  0xa4   : > { %1024 = vrsqrt.f32 %v250_v41  ;;  %vm290_vm8 = vcmp.eq.f32.partialorder %v250_v41, inf  ;;  %vm292_vm9 = vcmp.eq.f32.partialorder %v250_v41, 0.0  ;;  %v293_v20 = vand.u32 2147483648, %v250_v41 }
  0xa5   : > { %1026 = vrsqrt.f32 %v1230_v42  ;;  %v236_v45 = vpop.permute.xlu1 %235  ;;  %v234_v46 = vpop.permute.xlu0 %233  ;;  %vm283_vm10 = vcmp.eq.f32.partialorder %v1230_v42, inf  ;;  %v286_v23 = vand.u32 2147483648, %v1230_v42  ;;  %vm285_vm11 = vcmp.eq.f32.partialorder %v1230_v42, 0.0 }
  0xa6   : > { %v1233_v47 = vadd.f32 %v236_v45, %v220_v43  ;;  %v1235_v48 = vadd.f32 %v234_v46, %v219_v44 }
  0xa8   : > { %1028 = vrsqrt.f32 %v1233_v47  ;;  %vm304_vm12 = vcmp.eq.f32.partialorder %v1233_v47, inf  ;;  %vm306_vm13 = vcmp.eq.f32.partialorder %v1233_v47, 0.0  ;;  %v307_v32 = vand.u32 2147483648, %v1233_v47 }
  0xa9   : > { %v1017_v49 = vpop.eup %1016  ;;  %1030 = vrsqrt.f32 %v1235_v48  ;;  %vm297_vm14 = vcmp.eq.f32.partialorder %v1235_v48, inf  ;;  %vm299_vm15 = vcmp.eq.f32.partialorder %v1235_v48, 0.0 }
  0xaa   : > { %v1019_v50 = vpop.eup %1018  ;;  %v261_v51 = vmul.f32 %v1017_v49, %v246_v29 }
  0xab   : > { %v254_v53 = vmul.f32 %v1019_v50, %v245_v30 }
  0xac   : > { %v263_v54 = vsel %vm262_vm0, %v246_v29, %v261_v51  ;;  %vm557_vm0 = vcmask 23552  }
  0xad   : > { %v1021_v56 = vpop.eup %1020  ;;  %v266_v57 = vsel %vm264_vm1, %v265_v52, %v263_v54  ;;  %v256_v58 = vsel %vm255_vm2, %v245_v30, %v254_v53  ;;  %vm566_vm1 = vcmask 48128   ;;  %vm575_vm2 = vcmask 72704  }
  0xae   : > { %v1023_v59 = vpop.eup %1022  ;;  %v310_v60 = vadd.f32 1e-07, %v266_v57  ;;  %v259_v61 = vsel %vm257_vm3, %v258_v55, %v256_v58  ;;  %v275_v62 = vmul.f32 %v1021_v56, %v248_v35  ;;  %vm584_vm3 = vcmask 97280  }
  0xaf   : > { %v309_v63 = vadd.f32 1e-07, %v259_v61  ;;  %v268_v4 = vmul.f32 %v1023_v59, %v247_v36 }
  0xb0   : > { %1032 = vrcp.f32 %v310_v60  ;;  %v277_v6 = vsel %vm276_vm4, %v248_v35, %v275_v62  ;;  %v300_v35 = vand.u32 2147483648, %v1235_v48  ;;  %vm593_vm4 = vcmask 121856  }
  0xb1   : > { %v1025_v10 = vpop.eup %1024  ;;  %1034 = vrcp.f32 %v309_v63  ;;  %v280_v11 = vsel %vm278_vm5, %v279_v3, %v277_v6  ;;  %v270_v14 = vsel %vm269_vm6, %v247_v36, %v268_v4  ;;  %vm602_vm5 = vcmask 146432  }
  0xb2   : > { %v1027_v15 = vpop.eup %1026  ;;  %v312_v16 = vadd.f32 1e-07, %v280_v11  ;;  %v273_v17 = vsel %vm271_vm7, %v272_v7, %v270_v14  ;;  %v289_v18 = vmul.f32 %v1025_v10, %v250_v41  ;;  %vm611_vm6 = vcmask 171008  }
  0xb3   : > { %v311_v19 = vadd.f32 1e-07, %v273_v17  ;;  %v282_v21 = vmul.f32 %v1027_v15, %v1230_v42  ;;  %vm635_vm7 = vcmask 195584  }
  0xb4   : > { %1036 = vrcp.f32 %v312_v16  ;;  %v291_v22 = vsel %vm290_vm8, %v250_v41, %v289_v18 }
  0xb5   : > { %v1029_v24 = vpop.eup %1028  ;;  %1038 = vrcp.f32 %v311_v19  ;;  %v294_v25 = vsel %vm292_vm9, %v293_v20, %v291_v22  ;;  %v284_v26 = vsel %vm283_vm10, %v1230_v42, %v282_v21 }
  0xb6   : > { %v1031_v27 = vpop.eup %1030  ;;  %v314_v28 = vadd.f32 1e-07, %v294_v25  ;;  %v287_v29 = vsel %vm285_vm11, %v286_v23, %v284_v26  ;;  %v303_v30 = vmul.f32 %v1029_v24, %v1233_v47 }
  0xb7   : > { %v313_v31 = vadd.f32 1e-07, %v287_v29  ;;  %v296_v33 = vmul.f32 %v1031_v27, %v1235_v48 }
  0xb8   : > { %1040 = vrcp.f32 %v314_v28  ;;  %v305_v34 = vsel %vm304_vm12, %v1233_v47, %v303_v30 }
  0xb9   : > { %1042 = vrcp.f32 %v313_v31  ;;  %v308_v36 = vsel %vm306_vm13, %v307_v32, %v305_v34  ;;  %v298_v37 = vsel %vm297_vm14, %v1235_v48, %v296_v33 }
  0xba   : > { %v316_v38 = vadd.f32 1e-07, %v308_v36  ;;  %v301_v39 = vsel %vm299_vm15, %v300_v35, %v298_v37 }
  0xbb   : > { %v315_v40 = vadd.f32 1e-07, %v301_v39 }
  0xbc   : > { %1044 = vrcp.f32 %v316_v38 }
  0xbd   : > { %v1033_v41 = vpop.eup %1032  ;;  %1046 = vrcp.f32 %v315_v40 }
  0xbe   : > { %v1035_v42 = vpop.eup %1034  ;;  %340 = vperm.xlu1 %1015, %v1033_v41  }
  0xbf   : > { %335 = vperm.xlu0 %1014, %v1035_v42  }
  0xc1   : > { %v1037_v43 = vpop.eup %1036 }
  0xc2   : > { %v1039_v44 = vpop.eup %1038 }
  0xc3   : > { %350 = vperm.xlu0 %1014, %v1037_v43   ;;  %345 = vperm.xlu1 %1015, %v1039_v44  }
  0xc5   : > { %v1041_v45 = vpop.eup %1040 }
  0xc6   : > { %v1043_v46 = vpop.eup %1042 }
  0xc7   : > { %360 = vperm.xlu0 %1014, %v1041_v45   ;;  %355 = vperm.xlu1 %1015, %v1043_v46  }
  0xc9   : > { %v1045_v47 = vpop.eup %1044 }
  0xca   : > { %v1047_v49 = vpop.eup %1046 }
  0xcb   : > { %370 = vperm.xlu0 %1014, %v1045_v47   ;;  %365 = vperm.xlu1 %1015, %v1047_v49  }
 0x139   : > { %v341_v48 = vpop.permute.xlu1 %340 }
 0x13a   : > { %v1255_v50 = vmul.f32 %v341_v48, %v1208_v5  ;;  %v336_v51 = vpop.permute.xlu0 %335 }
 0x13b   : > { %v1258_v52 = vmul.f32 %v336_v51, %v1200_v1 }
 0x13c   : > { %391 = vrot.lane.b32.xlu0 %v1255_v50, %s1139_s26 }
 0x13d   : > { %389 = vrot.lane.b32.xlu1 %v1258_v52, %s1139_s26 }
 0x13e   : > { %v346_v53 = vpop.permute.xlu1 %345  ;;  %v351_v54 = vpop.permute.xlu0 %350 }
 0x13f   : > { %v1263_v55 = vmul.f32 %v346_v53, %v1198_v0  ;;  %v1266_v56 = vmul.f32 %v351_v54, %v1202_v2 }
 0x141   : > { %393 = vrot.lane.b32.xlu1 %v1263_v55, %s1139_s26  ;;  %395 = vrot.lane.b32.xlu0 %v1266_v56, %s1139_s26 }
 0x142   : > { %v356_v5 = vpop.permute.xlu1 %355  ;;  %v361_v1 = vpop.permute.xlu0 %360 }
 0x143   : > { %v1271_v57 = vmul.f32 %v356_v5, %v1216_v9  ;;  %v1274_v58 = vmul.f32 %v361_v1, %v1214_v8 }
 0x145   : > { %397 = vrot.lane.b32.xlu1 %v1271_v57, %s1139_s26  ;;  %399 = vrot.lane.b32.xlu0 %v1274_v58, %s1139_s26 }
 0x146   : > { %v366_v0 = vpop.permute.xlu1 %365  ;;  %v371_v59 = vpop.permute.xlu0 %370 }
 0x147   : > { %v1279_v2 = vmul.f32 %v366_v0, %v1224_v13  ;;  %v1282_v60 = vmul.f32 %v371_v59, %v1222_v12 }
 0x149   : > { %401 = vrot.lane.b32.xlu1 %v1279_v2, %s1139_s26  ;;  %403 = vrot.lane.b32.xlu0 %v1282_v60, %s1139_s26 }
 0x14d   : > { %413 = vrot.lane.b32.xlu1 %v1258_v52, %s1140_s27  ;;  %415 = vrot.lane.b32.xlu0 %v1255_v50, %s1140_s27 }
 0x151   : > { %417 = vrot.lane.b32.xlu1 %v1263_v55, %s1140_s27  ;;  %419 = vrot.lane.b32.xlu0 %v1266_v56, %s1140_s27 }
 0x155   : > { %421 = vrot.lane.b32.xlu1 %v1271_v57, %s1140_s27  ;;  %423 = vrot.lane.b32.xlu0 %v1274_v58, %s1140_s27 }
 0x159   : > { %425 = vrot.lane.b32.xlu1 %v1279_v2, %s1140_s27  ;;  %427 = vrot.lane.b32.xlu0 %v1282_v60, %s1140_s27 }
 0x15d   : > { %437 = vrot.lane.b32.xlu1 %v1258_v52, %s1141_s28  ;;  %439 = vrot.lane.b32.xlu0 %v1255_v50, %s1141_s28 }
 0x161   : > { %441 = vrot.lane.b32.xlu1 %v1263_v55, %s1141_s28  ;;  %443 = vrot.lane.b32.xlu0 %v1266_v56, %s1141_s28 }
 0x165   : > { %445 = vrot.lane.b32.xlu1 %v1271_v57, %s1141_s28  ;;  %447 = vrot.lane.b32.xlu0 %v1274_v58, %s1141_s28 }
 0x169   : > { %449 = vrot.lane.b32.xlu1 %v1279_v2, %s1141_s28  ;;  %451 = vrot.lane.b32.xlu0 %v1282_v60, %s1141_s28 }
 0x16d   : > { %461 = vrot.lane.b32.xlu1 %v1258_v52, %s1142_s29  ;;  %463 = vrot.lane.b32.xlu0 %v1255_v50, %s1142_s29 }
 0x171   : > { %465 = vrot.lane.b32.xlu1 %v1263_v55, %s1142_s29  ;;  %467 = vrot.lane.b32.xlu0 %v1266_v56, %s1142_s29 }
 0x175   : > { %469 = vrot.lane.b32.xlu1 %v1271_v57, %s1142_s29  ;;  %471 = vrot.lane.b32.xlu0 %v1274_v58, %s1142_s29 }
 0x179   : > { %473 = vrot.lane.b32.xlu1 %v1279_v2, %s1142_s29  ;;  %475 = vrot.lane.b32.xlu0 %v1282_v60, %s1142_s29 }
 0x17d   : > { %485 = vrot.lane.b32.xlu1 %v1258_v52, %s1143_s30  ;;  %487 = vrot.lane.b32.xlu0 %v1255_v50, %s1143_s30 }
 0x181   : > { %489 = vrot.lane.b32.xlu1 %v1263_v55, %s1143_s30  ;;  %491 = vrot.lane.b32.xlu0 %v1266_v56, %s1143_s30 }
 0x185   : > { %493 = vrot.lane.b32.xlu1 %v1271_v57, %s1143_s30  ;;  %495 = vrot.lane.b32.xlu0 %v1274_v58, %s1143_s30 }
 0x189   : > { %497 = vrot.lane.b32.xlu1 %v1279_v2, %s1143_s30  ;;  %499 = vrot.lane.b32.xlu0 %v1282_v60, %s1143_s30 }
 0x18d   : > { %509 = vrot.lane.b32.xlu1 %v1258_v52, %s1144_s3  ;;  %511 = vrot.lane.b32.xlu0 %v1255_v50, %s1144_s3 }
 0x191   : > { %513 = vrot.lane.b32.xlu1 %v1263_v55, %s1144_s3  ;;  %515 = vrot.lane.b32.xlu0 %v1266_v56, %s1144_s3 }
 0x195   : > { %517 = vrot.lane.b32.xlu1 %v1271_v57, %s1144_s3  ;;  %519 = vrot.lane.b32.xlu0 %v1274_v58, %s1144_s3 }
 0x199   : > { %521 = vrot.lane.b32.xlu1 %v1279_v2, %s1144_s3  ;;  %523 = vrot.lane.b32.xlu0 %v1282_v60, %s1144_s3 }
 0x19d   : > { %533 = vrot.lane.b32.xlu1 %v1258_v52, %s1145_s4  ;;  %535 = vrot.lane.b32.xlu0 %v1255_v50, %s1145_s4 }
 0x1a1   : > { %537 = vrot.lane.b32.xlu1 %v1263_v55, %s1145_s4  ;;  %539 = vrot.lane.b32.xlu0 %v1266_v56, %s1145_s4 }
 0x1a5   : > { %541 = vrot.lane.b32.xlu1 %v1271_v57, %s1145_s4  ;;  %543 = vrot.lane.b32.xlu0 %v1274_v58, %s1145_s4 }
 0x1a9   : > { %545 = vrot.lane.b32.xlu1 %v1279_v2, %s1145_s4  ;;  %547 = vrot.lane.b32.xlu0 %v1282_v60, %s1145_s4 }
 0x1ae   : > { %v392_v8 = vpop.permute.xlu0 %391 }
 0x1af   : > { %v390_v9 = vpop.permute.xlu1 %389  ;;  %v559_v6 = vsel %vm557_vm0, %v1255_v50, %v392_v8 }
 0x1b0   : > { %v558_v4 = vsel %vm557_vm0, %v1258_v52, %v390_v9 }
 0x1b3   : > { %v394_v12 = vpop.permute.xlu1 %393  ;;  %v396_v13 = vpop.permute.xlu0 %395 }
 0x1b4   : > { %v560_v15 = vsel %vm557_vm0, %v1263_v55, %v394_v12  ;;  %v561_v16 = vsel %vm557_vm0, %v1266_v56, %v396_v13 }
 0x1b7   : > { %v398_v61 = vpop.permute.xlu1 %397  ;;  %v400_v62 = vpop.permute.xlu0 %399 }
 0x1b8   : > { %v562_v21 = vsel %vm557_vm0, %v1271_v57, %v398_v61  ;;  %v563_v22 = vsel %vm557_vm0, %v1274_v58, %v400_v62 }
 0x1bb   : > { %v402_v63 = vpop.permute.xlu1 %401  ;;  %v404_v3 = vpop.permute.xlu0 %403 }
 0x1bc   : > { %v564_v27 = vsel %vm557_vm0, %v1279_v2, %v402_v63  ;;  %v565_v28 = vsel %vm557_vm0, %v1282_v60, %v404_v3  ;;  %v895_v63 = vld [vmem:[%s1524_s1] ss:$0 sm:$0xff] }
 0x1bf   : > { %v414_v7 = vpop.permute.xlu1 %413  ;;  %v416_v10 = vpop.permute.xlu0 %415 }
 0x1c0   : > { %v567_v11 = vsel %vm566_vm1, %v558_v4, %v414_v7  ;;  %v568_v14 = vsel %vm566_vm1, %v559_v6, %v416_v10 }
 0x1c3   : > { %v418_v17 = vpop.permute.xlu1 %417  ;;  %v420_v18 = vpop.permute.xlu0 %419 }
 0x1c4   : > { %v1345_v19 = vsel %vm566_vm1, %v560_v15, %v418_v17  ;;  %v1348_v20 = vsel %vm566_vm1, %v561_v16, %v420_v18 }
 0x1c7   : > { %v422_v23 = vpop.permute.xlu1 %421  ;;  %v424_v24 = vpop.permute.xlu0 %423 }
 0x1c8   : > { %v1355_v25 = vsel %vm566_vm1, %v562_v21, %v422_v23  ;;  %v1358_v26 = vsel %vm566_vm1, %v563_v22, %v424_v24 }
 0x1cb   : > { %v426_v29 = vpop.permute.xlu1 %425  ;;  %v428_v30 = vpop.permute.xlu0 %427 }
 0x1cc   : > { %v1365_v31 = vsel %vm566_vm1, %v564_v27, %v426_v29  ;;  %v1368_v32 = vsel %vm566_vm1, %v565_v28, %v428_v30 }
 0x1cf   : > { %v438_v33 = vpop.permute.xlu1 %437  ;;  %v440_v34 = vpop.permute.xlu0 %439 }
 0x1d0   : > { %v576_v8 = vsel %vm575_vm2, %v567_v11, %v438_v33  ;;  %v577_v9 = vsel %vm575_vm2, %v568_v14, %v440_v34 }
 0x1d3   : > { %v442_v35 = vpop.permute.xlu1 %441  ;;  %v444_v36 = vpop.permute.xlu0 %443 }
 0x1d4   : > { %v578_v10 = vsel %vm575_vm2, %v1345_v19, %v442_v35  ;;  %v579_v11 = vsel %vm575_vm2, %v1348_v20, %v444_v36 }
 0x1d7   : > { %v1370_v37 = vpop.permute.xlu1 %445  ;;  %v1372_v38 = vpop.permute.xlu0 %447 }
 0x1d8   : > { %v580_v28 = vsel %vm575_vm2, %v1355_v25, %v1370_v37  ;;  %v581_v29 = vsel %vm575_vm2, %v1358_v26, %v1372_v38 }
 0x1db   : > { %v1374_v39 = vpop.permute.xlu1 %449  ;;  %v1376_v40 = vpop.permute.xlu0 %451 }
 0x1df   : > { %v462_v41 = vpop.permute.xlu1 %461  ;;  %v464_v42 = vpop.permute.xlu0 %463 }
 0x1e0   : > { %v585_v12 = vsel %vm584_vm3, %v576_v8, %v462_v41  ;;  %v586_v13 = vsel %vm584_vm3, %v577_v9, %v464_v42 }
 0x1e3   : > { %v466_v43 = vpop.permute.xlu1 %465  ;;  %v468_v44 = vpop.permute.xlu0 %467 }
 0x1e4   : > { %v587_v16 = vsel %vm584_vm3, %v578_v10, %v466_v43  ;;  %v588_v17 = vsel %vm584_vm3, %v579_v11, %v468_v44  ;;  %v582_v44 = vsel %vm575_vm2, %v1365_v31, %v1374_v39 }
 0x1e7   : > { %v470_v45 = vpop.permute.xlu1 %469  ;;  %v472_v46 = vpop.permute.xlu0 %471 }
 0x1e8   : > { %v589_v34 = vsel %vm584_vm3, %v580_v28, %v470_v45  ;;  %v590_v35 = vsel %vm584_vm3, %v581_v29, %v472_v46  ;;  %v583_v45 = vsel %vm575_vm2, %v1368_v32, %v1376_v40 }
 0x1eb   : > { %v1378_v47 = vpop.permute.xlu1 %473  ;;  %v1380_v49 = vpop.permute.xlu0 %475 }
 0x1ef   : > { %v486_v48 = vpop.permute.xlu1 %485  ;;  %v488_v50 = vpop.permute.xlu0 %487 }
 0x1f0   : > { %v594_v61 = vsel %vm593_vm4, %v585_v12, %v486_v48  ;;  %v595_v62 = vsel %vm593_vm4, %v586_v13, %v488_v50  ;;  %v591_v50 = vsel %vm584_vm3, %v582_v44, %v1378_v47 }
 0x1f3   : > { %v490_v51 = vpop.permute.xlu1 %489  ;;  %v492_v52 = vpop.permute.xlu0 %491 }
 0x1f4   : > { %v596_v22 = vsel %vm593_vm4, %v587_v16, %v490_v51  ;;  %v597_v23 = vsel %vm593_vm4, %v588_v17, %v492_v52  ;;  %v592_v51 = vsel %vm584_vm3, %v583_v45, %v1380_v49 }
 0x1f7   : > { %v494_v53 = vpop.permute.xlu1 %493  ;;  %v496_v54 = vpop.permute.xlu0 %495 }
 0x1f8   : > { %v598_v42 = vsel %vm593_vm4, %v589_v34, %v494_v53  ;;  %v599_v43 = vsel %vm593_vm4, %v590_v35, %v496_v54 }
 0x1fb   : > { %v1382_v55 = vpop.permute.xlu1 %497  ;;  %v1384_v56 = vpop.permute.xlu0 %499 }
 0x1fc   : > { %v600_v31 = vsel %vm593_vm4, %v591_v50, %v1382_v55  ;;  %v601_v32 = vsel %vm593_vm4, %v592_v51, %v1384_v56 }
 0x1ff   : > { %v510_v5 = vpop.permute.xlu1 %509  ;;  %v512_v1 = vpop.permute.xlu0 %511 }
 0x200   : > { %v603_v3 = vsel %vm602_vm5, %v594_v61, %v510_v5  ;;  %v604_v4 = vsel %vm602_vm5, %v595_v62, %v512_v1 }
 0x203   : > { %v514_v57 = vpop.permute.xlu1 %513  ;;  %v516_v58 = vpop.permute.xlu0 %515 }
 0x204   : > { %v605_v24 = vsel %vm602_vm5, %v596_v22, %v514_v57  ;;  %v606_v19 = vsel %vm602_vm5, %v597_v23, %v516_v58 }
 0x207   : > { %v518_v0 = vpop.permute.xlu1 %517  ;;  %v520_v59 = vpop.permute.xlu0 %519 }
 0x208   : > { %v607_v25 = vsel %vm602_vm5, %v598_v42, %v518_v0  ;;  %v608_v37 = vsel %vm602_vm5, %v599_v43, %v520_v59 }
 0x20b   : > { %v522_v2 = vpop.permute.xlu1 %521  ;;  %v524_v60 = vpop.permute.xlu0 %523 }
 0x20c   : > { %v609_v39 = vsel %vm602_vm5, %v600_v31, %v522_v2  ;;  %v610_v40 = vsel %vm602_vm5, %v601_v32, %v524_v60 }
 0x20f   : > { %v534_v6 = vpop.permute.xlu1 %533  ;;  %v536_v7 = vpop.permute.xlu0 %535 }
 0x210   : > { %v612_v14 = vsel %vm611_vm6, %v603_v3, %v534_v6  ;;  %v613_v15 = vsel %vm611_vm6, %v604_v4, %v536_v7 }
 0x211   : > { %v627_v18 = vmul.f32 %v895_v63, %v612_v14  ;;  %v628_v21 = vmul.f32 %v895_v63, %v613_v15 }
 0x213   : > { %636 = vst.msk [vmem:[%s1410_s9] sm:$0xff] %vm635_vm7, %v627_v18  ;;  %637 = vst.msk [vmem:[%s1410_s9 + $0x8] sm:$0xff] %vm635_vm7, %v628_v21  ;;  %v538_v20 = vpop.permute.xlu1 %537  ;;  %v540_v27 = vpop.permute.xlu0 %539 }
 0x214   : > { %v614_v30 = vsel %vm611_vm6, %v605_v24, %v538_v20  ;;  %v615_v33 = vsel %vm611_vm6, %v606_v19, %v540_v27 }
 0x215   : > { %v629_v36 = vmul.f32 %v895_v63, %v614_v30  ;;  %v630_v41 = vmul.f32 %v895_v63, %v615_v33 }
 0x217   : > { %638 = vst.msk [vmem:[%s1410_s9 + $0x10] sm:$0xff] %vm635_vm7, %v629_v36  ;;  %639 = vst.msk [vmem:[%s1410_s9 + $0x18] sm:$0xff] %vm635_vm7, %v630_v41  ;;  %v542_v26 = vpop.permute.xlu1 %541  ;;  %v544_v38 = vpop.permute.xlu0 %543 }
 0x218   : > { %v616_v46 = vsel %vm611_vm6, %v607_v25, %v542_v26  ;;  %v617_v48 = vsel %vm611_vm6, %v608_v37, %v544_v38 }
 0x219   : > { %v631_v52 = vmul.f32 %v895_v63, %v616_v46  ;;  %v632_v53 = vmul.f32 %v895_v63, %v617_v48 }
 0x21b   : > { %640 = vst.msk [vmem:[%s1410_s9 + $0x20] sm:$0xff] %vm635_vm7, %v631_v52  ;;  %641 = vst.msk [vmem:[%s1410_s9 + $0x28] sm:$0xff] %vm635_vm7, %v632_v53  ;;  %v546_v47 = vpop.permute.xlu1 %545  ;;  %v548_v54 = vpop.permute.xlu0 %547  ;;  %650 = sbr.rel (!%p1186_p4) target bundleno = 583 (0x247), region = 32 }
 0x21c   : > { %v618_v49 = vsel %vm611_vm6, %v609_v39, %v546_v47  ;;  %v619_v5 = vsel %vm611_vm6, %v610_v40, %v548_v54 }
 0x21d   : > { %v633_v1 = vmul.f32 %v895_v63, %v618_v49  ;;  %v634_v57 = vmul.f32 %v895_v63, %v619_v5 }
 0x21f   : > { %642 = vst.msk [vmem:[%s1410_s9 + $0x30] sm:$0xff] %vm635_vm7, %v633_v1  ;;  %643 = vst.msk [vmem:[%s1410_s9 + $0x38] sm:$0xff] %vm635_vm7, %v634_v57 }
 0x220   : > { %s1534_s11 = smov (!%p653_p8, %s652_s11), 8 }
 0x221   : > { %s898_s21 = sshll.u32 %s1534_s11, 7 }
 0x222   : > { %p901_p9 = scmp.eq.s32.totalorder %s898_s21, 0 }
 0x223   : > { %s1475_s22 = sshrl.u32 (!%p901_p9), %s1534_s11, 3 }
 0x224   : > { %661 = sbr.rel (%p901_p9) target bundleno = 583 (0x247), region = 36  ;;  %p902_p10 = scmp.le.s32.totalorder (!%p901_p9), %s1475_s22, 0 }
 0x229   : > { %844 = sbr.rel (%p902_p10) target bundleno = 566 (0x236), region = 112  ;;  %s1527_s12 = smov (!%p902_p10), %s1469_s20 }
 0x22a   : > { %s1528_s17 = smov (!%p902_p10), %s1410_s9  ;;  %s1484_s18 = smov (!%p902_p10), 0  }
 0x22b   : > { %s1486_s23 = smov (!%p902_p10), 0  }
 0x22e LB: >> { %v738_v55 = vld [vmem:[%s1110_s17] sm:$0xff]  ;;  %v740_v56 = vld [vmem:[%s1110_s17 + $0x8] sm:$0xff]  ;;  %v742_v58 = vld [vmem:[%s1110_s17 + $0x10] sm:$0xff]  ;;  %s754_s24 = sadd.s32 1, %s1114_s18  ;;  %s732_s23 = sadd.s32 1, %s1118_s23   ;;  %s1118_s23 = sphi %s1486_s23, %s732_s23   ;;  %s1114_s18 = sphi %s1484_s18, %s1529_s18   ;;  %s1110_s17 = sphi %s1528_s17, %s759_s17   ;;  %s1106_s12 = sphi %s1527_s12, %s760_s12  }
 0x22f   : >> { %739 = vst [vmem:[%s1106_s12] sm:$0xff] %v738_v55  ;;  %741 = vst [vmem:[%s1106_s12 + $0x8] sm:$0xff] %v740_v56  ;;  %v744_v0 = vld [vmem:[%s1110_s17 + $0x18] sm:$0xff]  ;;  %v746_v59 = vld [vmem:[%s1110_s17 + $0x20] sm:$0xff]  ;;  %p755_p11 = scmp.ge.s32.totalorder %s754_s24, %s1475_s22  ;;  %p731_p12 = scmp.ge.s32.totalorder %s732_s23, %s1475_s22 }
 0x230   : >> { %743 = vst [vmem:[%s1106_s12 + $0x10] sm:$0xff] %v742_v58  ;;  %v748_v2 = vld [vmem:[%s1110_s17 + $0x28] sm:$0xff]  ;;  %745 = vst [vmem:[%s1106_s12 + $0x18] sm:$0xff] %v744_v0  ;;  %v750_v60 = vld [vmem:[%s1110_s17 + $0x30] sm:$0xff] }
 0x231   : >> { %747 = vst [vmem:[%s1106_s12 + $0x20] sm:$0xff] %v746_v59  ;;  %749 = vst [vmem:[%s1106_s12 + $0x28] sm:$0xff] %v748_v2  ;;  %v752_v8 = vld [vmem:[%s1110_s17 + $0x38] sm:$0xff]  ;;  %s1536_s24 = smov (%p755_p11, %s754_s24), 0  ;;  %734 = sbr.rel (!%p731_p12) target bundleno = 558 (0x22e), region = 118 }
 0x232   : >> { %751 = vst [vmem:[%s1106_s12 + $0x30] sm:$0xff] %v750_v60  ;;  %753 = vst [vmem:[%s1106_s12 + $0x38] sm:$0xff] %v752_v8  ;;  %s903_s25 = sshll.u32 %s1536_s24, 6  ;;  %s1529_s18 = smov %s1536_s24 }
 0x233   : >> { %s759_s17 = scalar_lea.vmem %s1410_s9, %s903_s25 [#allocation2]   ;;  %s760_s12 = scalar_lea.vmem %s1469_s20, %s903_s25  }
 0x236 PF: > { %s1505_s26 = sand.u32 7, %s1534_s11   ;;  %s914_s27 = sshll.u32 %s1475_s22, 6 }
 0x237   : > { %s765_s28 = scalar_lea.vmem %s1410_s9, %s914_s27 [#allocation2]   ;;  %s767_s29 = scalar_lea.vmem %s1469_s20, %s914_s27  }
 0x238   : > { %p908_p13 = scmp.le.s32.totalorder %s1505_s26, 0 }
 0x239   : > { %s1120_s30 = smov (!%p908_p13), %s767_s29   ;;  %s1124_s3 = smov (!%p908_p13), %s765_s28  }
 0x23a   : > { %858 = sbr.rel (%p908_p13) target bundleno = 583 (0x247), region = 123  ;;  %s1128_s4 = smov (!%p908_p13), 0  }
 0x23b   : > { %s1132_s5 = smov (!%p908_p13), 0  }
 0x23f LB: >> { %v777_v9 = vld [vmem:[%s1126_s3] sm:$0xff]  ;;  %s779_s6 = sadd.s32 1, %s1130_s4  ;;  %s771_s5 = sadd.s32 1, %s1134_s5   ;;  %s1134_s5 = sphi %s1132_s5, %s771_s5   ;;  %s1130_s4 = sphi %s1128_s4, %s1129_s4   ;;  %s1126_s3 = sphi %s1124_s3, %s784_s3   ;;  %s1122_s30 = sphi %s1120_s30, %s785_s30  }
 0x240   : >> { %778 = vst [vmem:[%s1122_s30] sm:$0xff] %v777_v9  ;;  %p780_p0 = scmp.ge.s32.totalorder %s779_s6, %s1505_s26  ;;  %p770_p1 = scmp.ge.s32.totalorder %s771_s5, %s1505_s26 }
 0x242   : >> { %s1538_s6 = smov (%p780_p0, %s779_s6), 0  ;;  %773 = sbr.rel (!%p770_p1) target bundleno = 575 (0x23f), region = 129 }
 0x243   : >> { %s909_s7 = sshll.u32 %s1538_s6, 3  ;;  %s1129_s4 = smov %s1538_s6  }
 0x244   : >> { %s784_s3 = scalar_lea.vmem %s765_s28, %s909_s7 [#allocation2]   ;;  %s785_s30 = scalar_lea.vmem %s767_s29, %s909_s7  }
 0x247 PF: > { %p9_p2 = scmp.ge.s32.totalorder %s1176_s13, 6   ;;  %s1530_s9 = smov %s1098_s10 }
 0x248   : > { %s1531_s10 = smov %s1184_s16  ;;  %s1532_s11 = smov %s1176_s13 }
 0x249   :  { %11 = sbr.rel (!%p9_p2) target bundleno = 2 (0x2), region = 140 }

</bundles_post_ra>
